<compile_context>
chip_gen: v5e
topology: v5e:2x2
jax: 0.10.0
libtpu: 0.0.40
codegen_flags: <defaults>
</compile_context>

<pallas_src>
import functools
import math

import jax
import jax.numpy as jnp
from jax import lax
from jax.experimental import pallas as pl
from jax.experimental.pallas import tpu as pltpu


# Cap on the fan-out (columns) of the block-diagonal grouped weight.
_GROUPED_N_CAP = 8192


# ---------------------------------------------------------------------------
# Hardware / capability queries (cached; execute eagerly even under a jit trace).
# ---------------------------------------------------------------------------

@functools.lru_cache(maxsize=None)
def _vmem_capacity_bytes():
    try:
        return int(pltpu.get_tpu_info().vmem_capacity_bytes)
    except Exception:
        return 64 << 20            # conservative (v7x-sized) if the query fails


@functools.lru_cache(maxsize=None)
def _weight_single_buffer_supported():
    """Whether pipeline_mode=pl.Buffered(1) compiles: stop double-buffering the
    resident weight (its block index never changes, the 2nd buffer is pure waste)."""
    try:
        def k(x_ref, o_ref):
            o_ref[...] = x_ref[...] + 1.0

        f = pl.pallas_call(
            k,
            out_shape=jax.ShapeDtypeStruct((16, 128), jnp.float32),
            grid=(2,),
            in_specs=[pl.BlockSpec((8, 128), lambda i: (0, 0),
                                   pipeline_mode=pl.Buffered(1))],
            out_specs=pl.BlockSpec((8, 128), lambda i: (i, 0)),
        )
        with jax.ensure_compile_time_eval():
            jax.block_until_ready(f(jnp.zeros((8, 128), jnp.float32)))
        return True
    except Exception:
        return False


@functools.lru_cache(maxsize=None)
def _highest_precision_dot_supported():
    """Whether the Mosaic dot lowering accepts precision=HIGHEST (full-f32 MXU)."""
    try:
        def k(x_ref, y_ref, o_ref):
            o_ref[...] = jnp.dot(x_ref[...], y_ref[...],
                                 preferred_element_type=jnp.float32,
                                 precision=lax.Precision.HIGHEST)

        f = pl.pallas_call(k, out_shape=jax.ShapeDtypeStruct((8, 128), jnp.float32))
        with jax.ensure_compile_time_eval():
            jax.block_until_ready(f(jnp.zeros((8, 128), jnp.float32),
                                    jnp.zeros((128, 128), jnp.float32)))
        return True
    except Exception:
        return False


def _matmul_precision(dtype):
    # Memory-bound kernel: full-f32 MXU passes are free; match PyTorch f32 Linear.
    if dtype == jnp.float32 and _highest_precision_dot_supported():
        return lax.Precision.HIGHEST
    return None


# ---------------------------------------------------------------------------
# The kernel: one row-tile of a (rows, K) @ (K, N) matmul.
# ---------------------------------------------------------------------------

def _rows_matmul_kernel(x_ref, w_ref, o_ref, *, precision):
    o_ref[...] = jnp.dot(
        x_ref[...], w_ref[...],
        preferred_element_type=jnp.float32,
        precision=precision,
    ).astype(o_ref.dtype)


def _pick_tiles(rows, k, n, itemsize, *, budget_bytes, weight_buffers,
                min_row_steps):
    """Choose (tm, tn, weight_resident) so streams + weight fit the VMEM budget."""
    sub = max(8, 32 // itemsize)          # packed sublane tile: f32 8 / bf16 16 / i8 32
    rows_up = -(-rows // sub) * sub

    weight_bytes = weight_buffers * k * n * itemsize
    resident = weight_bytes <= budget_bytes // 2
    if resident:
        tn = n
        row_bytes = 2 * (k + n) * itemsize           # double-buffered in + out per row
        tm = (budget_bytes - weight_bytes) // row_bytes
    else:
        # Weight too large to keep resident: tile the output columns (lane-dense tn)
        # instead of letting tm collapse / the scoped VMEM limit blow up.
        if n <= 128:
            tn = n
        else:
            tn_fit = (budget_bytes // 2) // max(1, 2 * k * itemsize)
            tn = max(128, min(min(n, 1024), (tn_fit // 128) * 128))
        row_bytes = 2 * (k + tn) * itemsize
        tm = (budget_bytes - 2 * k * tn * itemsize) // row_bytes

    tm = min(tm, 4096, rows_up)
    if min_row_steps > 1:                 # keep a few row-grid steps (v7x: 2 TCs)
        tm = min(tm, max(sub, -(-rows // min_row_steps)))
    tm = max(sub, (tm // sub) * sub)
    return tm, tn, resident


def _rows_matmul(x_rows, w, *, tm, tn, weight_resident, weight_single_buffer,
                 vmem_limit_bytes, precision):
    """(rows, K) @ (K, N) -> (rows, N), tiled over rows (and over N when the
    weight is not VMEM-resident).  Caller presents lane-dense tiles."""
    m, k = x_rows.shape
    _, n = w.shape
    kernel = functools.partial(_rows_matmul_kernel, precision=precision)

    if weight_resident:
        w_kwargs = {}
        if weight_single_buffer:
            # Weight block index never changes -> a second buffer is VMEM waste.
            w_kwargs = dict(pipeline_mode=pl.Buffered(1))
        grid = (pl.cdiv(m, tm),)
        in_specs = [
            pl.BlockSpec((tm, k), lambda i: (i, 0)),
            pl.BlockSpec((k, n), lambda i: (0, 0), **w_kwargs),
        ]
        out_specs = pl.BlockSpec((tm, n), lambda i: (i, 0))
        dims = ("parallel",)
    else:
        grid = (pl.cdiv(m, tm), pl.cdiv(n, tn))
        in_specs = [
            pl.BlockSpec((tm, k), lambda i, j: (i, 0)),
            pl.BlockSpec((k, tn), lambda i, j: (0, j)),
        ]
        out_specs = pl.BlockSpec((tm, tn), lambda i, j: (i, j))
        dims = ("parallel", "parallel")

    return pl.pallas_call(
        kernel,
        out_shape=jax.ShapeDtypeStruct((m, n), x_rows.dtype),
        grid_spec=pltpu.PrefetchScalarGridSpec(
            num_scalar_prefetch=0,
            grid=grid,
            in_specs=in_specs,
            out_specs=out_specs,
        ),
        compiler_params=pltpu.CompilerParams(
            dimension_semantics=dims,
            vmem_limit_bytes=vmem_limit_bytes,
        ),
    )(x_rows, w)


# ---------------------------------------------------------------------------
# TaosPatchEmbedding forward.
# ---------------------------------------------------------------------------

def _choose_group(M, T, H, itemsize):
    """Patches packed per kernel row.  g is a multiple of 128 // gcd(H, 128) so
    the output row width g*H is a multiple of 128 (lane-dense stores for any H);
    it grows by powers of two while it still divides M (no padding needed) to
    also densify the K = g*T input columns."""
    g0 = 128 // math.gcd(H, 128)
    if g0 == 1:
        return 1                                    # H % 128 == 0: already lane-dense
    if g0 * H > _GROUPED_N_CAP:
        return 1                                    # block-diagonal weight too wide
    g = g0
    while (M % (2 * g) == 0
           and g * T < 128
           and 2 * g * H <= _GROUPED_N_CAP
           and (2 * g * T) * (2 * g * H) * itemsize <= (4 << 20)):
        g *= 2
    return g


def taos_patch_embedding(x, weight):
    """TaosPatchEmbedding.forward.

    x: (B, L); weight: (H, T) in PyTorch nn.Linear layout (out_features, in_features).
    Returns (B, L // T, H).  Like torch.unfold(step=T), any trailing remainder of
    L not divisible by T is dropped.
    """
    H, T = weight.shape
    B, L = x.shape
    P = L // T
    if P == 0:
        return jnp.zeros((B, 0, H), dtype=x.dtype)
    M = B * P

    if L != P * T:
        # torch.unfold(step=T) drops the remainder.
        # TODO(synk): read the original (B, L) array through the BlockSpec
        # index_map instead of materializing this input-side slice.
        x = x[:, : P * T]

    weight = weight.astype(x.dtype)
    itemsize = jnp.dtype(x.dtype).itemsize
    precision = _matmul_precision(x.dtype)

    # Per-generation VMEM policy (conservative when the query is unavailable).
    if _vmem_capacity_bytes() >= (100 << 20):        # v5e / v6e: 128 MiB physical
        budget, vmem_limit, min_row_steps = 32 << 20, 64 << 20, 1
    else:                                            # v7x (64 MiB) or unknown
        budget, vmem_limit, min_row_steps = 16 << 20, 48 << 20, 8

    single_buf = _weight_single_buffer_supported()
    weight_buffers = 1 if single_buf else 2

    flat = x.reshape(M * T)                          # row-major == patch order (free)
    g = _choose_group(M, T, H, itemsize)

    if g > 1:
        # Lane-dense grouped path: pack g patches per row (K = g*T) and multiply
        # by a block-diagonal (g*T, g*H) weight; g*H % 128 == 0 so loads, the MXU
        # contraction and -- critically -- the stores are all 128-lane dense.
        Mg = pl.cdiv(M, g)
        padded = (Mg * g != M)
        if padded:
            # Rare: g is a power of two and M = B * (L // T) is usually divisible.
            # TODO(synk): handle the ragged tail inside the kernel instead of this
            # input pad + output slice (adds one extra HBM pass over the output).
            flat = jnp.pad(flat, (0, Mg * g * T - M * T))
        x_rows = flat.reshape(Mg, g * T)                             # free reshape
        wt = weight.T                                                # (T, H)
        # w_bd[i*T + t, j*H + h] = (i == j) * wt[t, h]
        w_bd = (jnp.eye(g, dtype=x.dtype)[:, None, :, None]
                * wt[None, :, None, :]).reshape(g * T, g * H)
        tm, tn, resident = _pick_tiles(Mg, g * T, g * H, itemsize,
                                       budget_bytes=budget,
                                       weight_buffers=weight_buffers,
                                       min_row_steps=min_row_steps)
        out = _rows_matmul(x_rows, w_bd, tm=tm, tn=tn,
                           weight_resident=resident,
                           weight_single_buffer=single_buf,
                           vmem_limit_bytes=vmem_limit,
                           precision=precision)                      # (Mg, g*H)
        out = out.reshape(Mg * g, H)                                 # free reshape
        if padded:
            out = out[:M]
    else:
        # H % 128 == 0 (output already lane-dense) or grouping not applicable.
        x_rows = flat.reshape(M, T)
        tm, tn, resident = _pick_tiles(M, T, H, itemsize,
                                       budget_bytes=budget,
                                       weight_buffers=weight_buffers,
                                       min_row_steps=min_row_steps)
        out = _rows_matmul(x_rows, weight.T, tm=tm, tn=tn,
                           weight_resident=resident,
                           weight_single_buffer=single_buf,
                           vmem_limit_bytes=vmem_limit,
                           precision=precision)                      # (M, H)

    return out.reshape(B, P, H)


# ---------------------------------------------------------------------------
# Reference + self-test.
# ---------------------------------------------------------------------------

def _reference(x, weight, precision=None):
    H, T = weight.shape
    B, L = x.shape
    P = L // T
    patches = x[:, : P * T].reshape(B, P, T)
    return jnp.einsum("bpt,ht->bph", patches, weight, precision=precision)


if __name__ == "__main__":
    key = jax.random.PRNGKey(0)
    k1, k2, k3, k4 = jax.random.split(key, 4)

    fn = jax.jit(taos_patch_embedding)

    # Case 1: small config (Taos_input_token_len=4, Taos_hidden_size=32)
    # -> exercises the grouped / block-diagonal lane-dense path (g*H % 128 == 0).
    B, L, T, H = 2, 32, 4, 32
    x = jax.random.normal(k1, (B, L), dtype=jnp.float32)
    bound = 1.0 / (T ** 0.5)
    w = jax.random.uniform(k2, (H, T), jnp.float32, minval=-bound, maxval=bound)
    out = jax.block_until_ready(fn(x, w))
    ref = _reference(x, w, precision=_matmul_precision(jnp.float32))
    assert out.shape == (B, L // T, H)
    assert jnp.allclose(out, ref, atol=1e-5, rtol=1e-5)

    # Case 2: hidden size already a multiple of 128 (T=1, H=256)
    # -> exercises the plain resident-weight, lane-dense-output path.
    B2, L2, T2, H2 = 2, 16, 1, 256
    x2 = jax.random.normal(k3, (B2, L2), dtype=jnp.float32)
    bound2 = 1.0 / (T2 ** 0.5)
    w2 = jax.random.uniform(k4, (H2, T2), jnp.float32, minval=-bound2, maxval=bound2)
    out2 = jax.block_until_ready(fn(x2, w2))
    ref2 = _reference(x2, w2, precision=_matmul_precision(jnp.float32))
    assert out2.shape == (B2, L2 // T2, H2)
    assert jnp.allclose(out2, ref2, atol=1e-5, rtol=1e-5)

    print("KERNEL_OK")
</pallas_src>

<mosaic_0001>
module attributes {stable_mosaic.version = 11 : i64} {
  func.func @_rows_matmul_kernel(%arg0: i32, %arg1: memref<8x64xf32, #tpu.memory_space<vmem>>, %arg2: memref<64x512xf32, #tpu.memory_space<vmem>>, %arg3: memref<8x512xf32, #tpu.memory_space<vmem>>) attributes {dimension_semantics = [#tpu.dimension_semantics<parallel>], iteration_bounds = array<i64: 1>, scalar_prefetch = 0 : i64, scratch_operands = 0 : i64, tpu.core_type = #tpu.core_type<tc>, window_params = [{transform_indices = @transform_0, window_bounds = array<i64: 8, 64>}, {pipeline_mode = #tpu.pipeline_mode<synchronous>, transform_indices = @transform_1, window_bounds = array<i64: 64, 512>}, {transform_indices = @transform_2, window_bounds = array<i64: 8, 512>}]} {
    %c0 = arith.constant 0 : index
    %c0_0 = arith.constant 0 : index
    %0 = vector.load %arg1[%c0, %c0_0] : memref<8x64xf32, #tpu.memory_space<vmem>>, vector<8x64xf32>
    %c0_1 = arith.constant 0 : index
    %c0_2 = arith.constant 0 : index
    %1 = vector.load %arg2[%c0_1, %c0_2] : memref<64x512xf32, #tpu.memory_space<vmem>>, vector<64x512xf32>
    %cst = arith.constant dense<0.000000e+00> : vector<8x512xf32>
    %2 = tpu.matmul %0, %1, %cst {dimension_numbers = #tpu.dot_dimension_numbers<[1], [0], [0], [1], [0, 0, 1, 1], [], []>} : vector<8x64xf32>, vector<64x512xf32>, vector<8x512xf32> -> vector<8x512xf32>
    %c0_3 = arith.constant 0 : index
    %c0_4 = arith.constant 0 : index
    %3 = vector.load %arg3[%c0_3, %c0_4] : memref<8x512xf32, #tpu.memory_space<vmem>>, vector<8x512xf32>
    tpu.vector_store %arg3[%c0_3, %c0_4], %2 {strides = array<i32>} : memref<8x512xf32, #tpu.memory_space<vmem>>, vector<8x512xf32>,
    return
  }
  func.func @transform_0(%arg0: i32) -> (i32, i32) {
    %c0_i32 = arith.constant 0 : i32
    %c0_i32_0 = arith.constant 0 : i32
    return %arg0, %c0_i32 : i32, i32
  }
  func.func @transform_1(%arg0: i32) -> (i32, i32) {
    %c0_i32 = arith.constant 0 : i32
    %c0_i32_0 = arith.constant 0 : i32
    %c0_i32_1 = arith.constant 0 : i32
    return %c0_i32, %c0_i32_0 : i32, i32
  }
  func.func @transform_2(%arg0: i32) -> (i32, i32) {
    %c0_i32 = arith.constant 0 : i32
    %c0_i32_0 = arith.constant 0 : i32
    return %arg0, %c0_i32 : i32, i32
  }
}

</mosaic_0001>

<bundles_post_ra>
// kernel: taos_patch_embedding.1
= control target key start
LH: loop header
LB: loop body
LE: loop exit
PB: predicated region body
PF: predicated region fallthrough
CT: control target
= control target key end

     0   :  { %vm44_vm0 = vcmask 523264   ;;  %vm135_vm1 = vcmask 1040384   ;;  %vm137_vm2 = vcmask 1042434   ;;  %v190_v33 = vlaneseq  ;;  %s368_s0 = inlined_call_operand.vmem [shape: f32[1,64], index: 0, kind: input, shape index: {}]   ;;  %s369_s1 = inlined_call_operand.vmem [shape: f32[64,512], index: 1, kind: input, shape index: {}]   ;;  %s370_s2 = inlined_call_operand.vmem [shape: f32[1,512], index: 2, kind: output, shape index: {}]  }
   0x1   :  { %v42_v0 = vld [vmem:[%s369_s1 + $0xf0] sm:$0xff]  ;;  %v43_v1 = vld [vmem:[%s369_s1 + $0xf8] sm:$0xff]  ;;  %v41_v6 = vld [vmem:[%s369_s1 + $0xe8] sm:$0xff]  ;;  %vm139_vm3 = vcmask 1041408  }
   0x2   :  { %v38_v2 = vld [vmem:[%s369_s1 + $0xd0] sm:$0xff]  ;;  %96 = vmatpush.msra.mxu2 %v42_v0  ;;  %116 = vmatpush.msra.mxu3 %v43_v1  ;;  %v39_v3 = vld [vmem:[%s369_s1 + $0xd8] sm:$0xff]  ;;  %v40_v7 = vld [vmem:[%s369_s1 + $0xe0] sm:$0xff]  ;;  %vm192_vm4 = vcmp.lt.s32.totalorder %v190_v33, 512 }
   0x3   :  { %v34_v4 = vld [vmem:[%s369_s1 + $0xb0] sm:$0xff]  ;;  %v35_v5 = vld [vmem:[%s369_s1 + $0xb8] sm:$0xff]  ;;  %v37_v8 = vld [vmem:[%s369_s1 + $0xc8] sm:$0xff]  ;;  %76 = vmatpush.msra.mxu1 %v41_v6  ;;  %56 = vmatpush.msra.mxu0 %v40_v7 }
   0x4   :  { %97 = vmatpush.msra.mxu2 %v38_v2  ;;  %117 = vmatpush.msra.mxu3 %v39_v3  ;;  %v30_v9 = vld [vmem:[%s369_s1 + $0x90] sm:$0xff]  ;;  %v31_v10 = vld [vmem:[%s369_s1 + $0x98] sm:$0xff]  ;;  %v36_v11 = vld [vmem:[%s369_s1 + $0xc0] sm:$0xff] }
   0x5   :  { %v33_v12 = vld [vmem:[%s369_s1 + $0xa8] sm:$0xff]  ;;  %v32_v13 = vld [vmem:[%s369_s1 + $0xa0] sm:$0xff]  ;;  %77 = vmatpush.msra.mxu1 %v37_v8  ;;  %v26_v14 = vld [vmem:[%s369_s1 + $0x70] sm:$0xff]  ;;  %57 = vmatpush.msra.mxu0 %v36_v11 }
   0x6   :  { %98 = vmatpush.msra.mxu2 %v34_v4  ;;  %118 = vmatpush.msra.mxu3 %v35_v5  ;;  %v27_v15 = vld [vmem:[%s369_s1 + $0x78] sm:$0xff]  ;;  %v29_v16 = vld [vmem:[%s369_s1 + $0x88] sm:$0xff]  ;;  %v28_v17 = vld [vmem:[%s369_s1 + $0x80] sm:$0xff] }
   0x7   :  { %78 = vmatpush.msra.mxu1 %v33_v12  ;;  %v22_v18 = vld [vmem:[%s369_s1 + $0x50] sm:$0xff]  ;;  %v23_v19 = vld [vmem:[%s369_s1 + $0x58] sm:$0xff]  ;;  %58 = vmatpush.msra.mxu0 %v32_v13  ;;  %v25_v20 = vld [vmem:[%s369_s1 + $0x68] sm:$0xff] }
   0x8   :  { %99 = vmatpush.msra.mxu2 %v30_v9  ;;  %119 = vmatpush.msra.mxu3 %v31_v10  ;;  %v24_v21 = vld [vmem:[%s369_s1 + $0x60] sm:$0xff]  ;;  %v18_v22 = vld [vmem:[%s369_s1 + $0x30] sm:$0xff]  ;;  %v19_v23 = vld [vmem:[%s369_s1 + $0x38] sm:$0xff] }
   0x9   :  { %79 = vmatpush.msra.mxu1 %v29_v16  ;;  %59 = vmatpush.msra.mxu0 %v28_v17  ;;  %v21_v24 = vld [vmem:[%s369_s1 + $0x48] sm:$0xff]  ;;  %v20_v25 = vld [vmem:[%s369_s1 + $0x40] sm:$0xff]  ;;  %v14_v26 = vld [vmem:[%s369_s1 + $0x10] sm:$0xff] }
   0xa   :  { %100 = vmatpush.msra.mxu2 %v26_v14  ;;  %120 = vmatpush.msra.mxu3 %v27_v15  ;;  %v15_v27 = vld [vmem:[%s369_s1 + $0x18] sm:$0xff]  ;;  %v11_v28 = vld [vmem:[%s368_s0] sm:$0xff]  ;;  %v17_v29 = vld [vmem:[%s369_s1 + $0x28] sm:$0xff] }
   0xb   :  { %80 = vmatpush.msra.mxu1 %v25_v20  ;;  %60 = vmatpush.msra.mxu0 %v24_v21  ;;  %v16_v30 = vld [vmem:[%s369_s1 + $0x20] sm:$0xff]  ;;  %v13_v31 = vld [vmem:[%s369_s1 + $0x8] sm:$0xff] }
   0xc   :  { %101 = vmatpush.msra.mxu2 %v22_v18  ;;  %121 = vmatpush.msra.mxu3 %v23_v19  ;;  %v12_v32 = vld [vmem:[%s369_s1] sm:$0xff] }
   0xd   :  { %81 = vmatpush.msra.mxu1 %v21_v24  ;;  %61 = vmatpush.msra.mxu0 %v20_v25 }
   0xe   :  { %102 = vmatpush.msra.mxu2 %v18_v22  ;;  %122 = vmatpush.msra.mxu3 %v19_v23 }
   0xf   :  { %82 = vmatpush.msra.mxu1 %v17_v29  ;;  %62 = vmatpush.msra.mxu0 %v16_v30 }
  0x10   :  { %103 = vmatpush.msra.mxu2 %v14_v26  ;;  %123 = vmatpush.msra.mxu3 %v15_v27 }
  0x11   :  { %245 = vmatmul.msk.f32.vlgmr.msra.gmra.mxu2 %vm44_vm0, %v11_v28  ;;  %246 = vmatmul.msk.f32.vlgmr.msra.gmra.mxu3 %vm44_vm0, %v11_v28 }
  0x12   :  { %83 = vmatpush.msra.mxu1 %v13_v31  ;;  %63 = vmatpush.msra.mxu0 %v12_v32 }
  0x13   :  { %244 = vmatmul.msk.f32.vlgmr.msra.gmra.mxu1 %vm44_vm0, %v11_v28  ;;  %243 = vmatmul.msk.f32.vlgmr.msra.gmra.mxu0 %vm44_vm0, %v11_v28 }
  0x90   :  { %v85_v34 = vpop.f32.mrf.mxu1  ;;  %v65_v35 = vpop.f32.mrf.mxu0 }
  0x91   :  { %v132_v36 = vrot.slane %v85_v34, 7 }
  0x93   :  { %v136_v41 = vsel %vm135_vm1, %v65_v35, %v132_v36 }
  0x94   :  { %v105_v37 = vpop.f32.mrf.mxu2  ;;  %v125_v38 = vpop.f32.mrf.mxu3 }
  0x95   :  { %v133_v39 = vrot.slane %v105_v37, 6  ;;  %v134_v40 = vrot.slane %v125_v38, 5 }
  0x97   :  { %v138_v42 = vsel %vm137_vm2, %v133_v39, %v134_v40 }
  0x98   :  { %v140_v43 = vsel %vm139_vm3, %v136_v41, %v138_v42 }
  0x99   :  { %194 = vst.msk [vmem:[#allocation2] sm:$0xf] %vm192_vm4, %v140_v43 }
  0xa0   :  { %v220_v44 = vld [vmem:[#allocation2] sm:$0xf] }
  0xa1   :  { %221 = vst [vmem:[%s370_s2] sm:$0xf] %v220_v44 }

</bundles_post_ra>
